<compile_context>
chip_gen: v5e
topology: v5e:2x2
jax: 0.10.0
libtpu: 0.0.40
codegen_flags: <defaults>
</compile_context>

<pallas_src>
import functools

import jax
import jax.numpy as jnp
from jax.experimental import pallas as pl
from jax.experimental.pallas import tpu as pltpu


def _round_up(x, m):
    return ((x + m - 1) // m) * m


def _patch_embed_kernel(x_ref, w_ref, b_ref, o_ref):
    # x_ref: (TM, K)  streamed patch tile
    # w_ref: (K, N)   resident projection weight (C*p*p, padded embed_dim)
    # b_ref: (1, N)   resident bias
    # o_ref: (TM, N)  output tile (lane-dense: N is a multiple of 128)
    acc = jnp.dot(x_ref[...], w_ref[...], preferred_element_type=jnp.float32)
    o_ref[...] = (acc + b_ref[...]).astype(o_ref.dtype)


def _pick_tile_m(M, K, N, itemsize, vmem_budget_bytes=8 * 1024 * 1024):
    """Largest sublane-aligned TM whose double-buffered tiles fit the budget."""
    # Double-buffered input tile + double-buffered output tile per row:
    bytes_per_row = 2 * (K + N) * itemsize
    tm = max(8, (vmem_budget_bytes // max(bytes_per_row, 1)) // 8 * 8)
    tm = min(tm, 1024)                       # diminishing returns past ~1k rows
    tm = min(tm, _round_up(M, 8))            # don't exceed (padded) problem size
    return _round_up(tm, 8)


def patch_embed_swin(x, weight, bias, patch_size, *, tile_m=None):
    """Forward of PatchEmbed_swin (norm_layer=None).

    Args:
      x:      (B, C, H, W)  NCHW input, like PyTorch.
      weight: (embed_dim, C, p, p)  Conv2d weight.
      bias:   (embed_dim,)          Conv2d bias.
      patch_size: int p, with H % p == 0 and W % p == 0.
      tile_m: optional override for rows of the patch matrix per grid step.

    Returns:
      (B, num_patches, embed_dim)
    """
    B, C, H, W = x.shape
    p = patch_size
    E = weight.shape[0]
    assert H % p == 0 and W % p == 0, "image size must be divisible by patch size"
    Hp, Wp = H // p, W // p
    num_patches = Hp * Wp
    M = B * num_patches
    K = C * p * p

    # Extract non-overlapping patches -> (M, K), flattened in (C, i, j) order to
    # match Conv2d weight flattening.  Intended to fuse into the kernel's input
    # DMA via allow_input_fusion when called under jit.
    xp = x.reshape(B, C, Hp, p, Wp, p)
    xp = jnp.transpose(xp, (0, 2, 4, 1, 3, 5)).reshape(M, K)

    w2d = weight.reshape(E, K).T               # (K, E)
    b2d = bias.reshape(1, E)                   # (1, E)

    # Lane-dense output: pad embed dim up to a multiple of 128 (zero columns).
    N = _round_up(E, 128)
    if N != E:
        w2d = jnp.pad(w2d, ((0, 0), (0, N - E)))
        b2d = jnp.pad(b2d, ((0, 0), (0, N - E)))

    # Tile M (sublane-aligned), pad to a whole number of tiles.
    if tile_m is None:
        TM = _pick_tile_m(M, K, N, jnp.dtype(x.dtype).itemsize)
    else:
        TM = _round_up(min(tile_m, _round_up(M, 8)), 8)
    M_pad = _round_up(M, TM)
    if M_pad != M:
        xp = jnp.pad(xp, ((0, M_pad - M), (0, 0)))

    grid = (M_pad // TM,)

    out = pl.pallas_call(
        _patch_embed_kernel,
        out_shape=jax.ShapeDtypeStruct((M_pad, N), x.dtype),
        grid_spec=pltpu.PrefetchScalarGridSpec(
            num_scalar_prefetch=0,
            grid=grid,
            in_specs=[
                pl.BlockSpec((TM, K), lambda i: (i, 0)),  # streamed patch tile
                pl.BlockSpec((K, N), lambda i: (0, 0)),   # resident weight
                pl.BlockSpec((1, N), lambda i: (0, 0)),   # resident bias
            ],
            out_specs=pl.BlockSpec((TM, N), lambda i: (i, 0)),
        ),
        compiler_params=pltpu.CompilerParams(
            dimension_semantics=("parallel",),
            allow_input_fusion=[True, False, False],
        ),
    )(xp, w2d, b2d)

    # Drop M/N padding and restore (B, num_patches, embed_dim).
    return out[:M, :E].reshape(B, num_patches, E)


if __name__ == "__main__":
    # Small shapes consistent with the module:
    #   img_size=16, patch_size=4, in_chans=4, embed_dim=32, batch=2
    B, C, H, W = 2, 4, 16, 16
    p = 4
    E = 32

    key = jax.random.PRNGKey(0)
    kx, kw, kb = jax.random.split(key, 3)
    x = jax.random.normal(kx, (B, C, H, W), dtype=jnp.float32)
    weight = jax.random.normal(kw, (E, C, p, p), dtype=jnp.float32) * 0.05
    bias = jax.random.normal(kb, (E,), dtype=jnp.float32) * 0.05

    fwd = jax.jit(functools.partial(patch_embed_swin, patch_size=p))
    out = jax.block_until_ready(fwd(x, weight, bias))

    # Pure-JAX reference: strided conv == per-patch linear projection.
    Hp, Wp = H // p, W // p
    xp_ref = x.reshape(B, C, Hp, p, Wp, p)
    xp_ref = jnp.transpose(xp_ref, (0, 2, 4, 1, 3, 5)).reshape(B, Hp * Wp, C * p * p)
    ref = jnp.einsum("bmk,ek->bme", xp_ref, weight.reshape(E, C * p * p)) + bias

    assert out.shape == (B, Hp * Wp, E)
    assert jnp.allclose(out, ref, atol=1e-4, rtol=1e-4)
    print("KERNEL_OK")
</pallas_src>

<mosaic_0001>
module attributes {stable_mosaic.version = 11 : i64} {
  func.func @_patch_embed_kernel(%arg0: i32, %arg1: memref<32x64xf32, #tpu.memory_space<vmem>>, %arg2: memref<64x128xf32, #tpu.memory_space<vmem>>, %arg3: memref<1x128xf32, #tpu.memory_space<vmem>>, %arg4: memref<32x128xf32, #tpu.memory_space<vmem>>) attributes {dimension_semantics = [#tpu.dimension_semantics<parallel>], iteration_bounds = array<i64: 1>, scalar_prefetch = 0 : i64, scratch_operands = 0 : i64, tpu.core_type = #tpu.core_type<tc>, window_params = [{transform_indices = @transform_0, window_bounds = array<i64: 32, 64>}, {pipeline_mode = #tpu.pipeline_mode<synchronous>, transform_indices = @transform_1, window_bounds = array<i64: 64, 128>}, {pipeline_mode = #tpu.pipeline_mode<synchronous>, transform_indices = @transform_2, window_bounds = array<i64: 1, 128>}, {transform_indices = @transform_3, window_bounds = array<i64: 32, 128>}]} {
    %c0 = arith.constant 0 : index
    %c0_0 = arith.constant 0 : index
    %0 = vector.load %arg1[%c0, %c0_0] : memref<32x64xf32, #tpu.memory_space<vmem>>, vector<32x64xf32>
    %c0_1 = arith.constant 0 : index
    %c0_2 = arith.constant 0 : index
    %1 = vector.load %arg2[%c0_1, %c0_2] : memref<64x128xf32, #tpu.memory_space<vmem>>, vector<64x128xf32>
    %cst = arith.constant dense<0.000000e+00> : vector<32x128xf32>
    %2 = tpu.matmul %0, %1, %cst {dimension_numbers = #tpu.dot_dimension_numbers<[1], [0], [0], [1], [0, 0, 1, 1], [], []>} : vector<32x64xf32>, vector<64x128xf32>, vector<32x128xf32> -> vector<32x128xf32>
    %c0_3 = arith.constant 0 : index
    %c0_4 = arith.constant 0 : index
    %3 = vector.load %arg3[%c0_3, %c0_4] : memref<1x128xf32, #tpu.memory_space<vmem>>, vector<1x128xf32>
    %4 = vector.broadcast %3 : vector<1x128xf32> to vector<32x128xf32>
    %5 = arith.addf %2, %4 : vector<32x128xf32>
    %c0_5 = arith.constant 0 : index
    %c0_6 = arith.constant 0 : index
    %6 = vector.load %arg4[%c0_5, %c0_6] : memref<32x128xf32, #tpu.memory_space<vmem>>, vector<32x128xf32>
    tpu.vector_store %arg4[%c0_5, %c0_6], %5 {strides = array<i32>} : memref<32x128xf32, #tpu.memory_space<vmem>>, vector<32x128xf32>,
    return
  }
  func.func @transform_0(%arg0: i32) -> (i32, i32) {
    %c0_i32 = arith.constant 0 : i32
    %c0_i32_0 = arith.constant 0 : i32
    return %arg0, %c0_i32 : i32, i32
  }
  func.func @transform_1(%arg0: i32) -> (i32, i32) {
    %c0_i32 = arith.constant 0 : i32
    %c0_i32_0 = arith.constant 0 : i32
    %c0_i32_1 = arith.constant 0 : i32
    return %c0_i32, %c0_i32_0 : i32, i32
  }
  func.func @transform_2(%arg0: i32) -> (i32, i32) {
    %c0_i32 = arith.constant 0 : i32
    %c0_i32_0 = arith.constant 0 : i32
    %c0_i32_1 = arith.constant 0 : i32
    return %c0_i32, %c0_i32_0 : i32, i32
  }
  func.func @transform_3(%arg0: i32) -> (i32, i32) {
    %c0_i32 = arith.constant 0 : i32
    %c0_i32_0 = arith.constant 0 : i32
    return %arg0, %c0_i32 : i32, i32
  }
}

</mosaic_0001>

<bundles_post_ra>
// kernel: patch_embed_swin.1
= control target key start
LH: loop header
LB: loop body
LE: loop exit
PB: predicated region body
PF: predicated region fallthrough
CT: control target
= control target key end

     0   :  { %s218_s0 = inlined_call_operand.vmem [shape: f32[32,64], index: 0, kind: input, shape index: {}]   ;;  %s219_s1 = inlined_call_operand.vmem [shape: f32[64,128], index: 1, kind: input, shape index: {}]   ;;  %s220_s2 = inlined_call_operand.vmem [shape: f32[1,128], index: 2, kind: input, shape index: {}]   ;;  %s221_s3 = inlined_call_operand.hbm [shape: f32[32,128], index: 3, kind: output, shape index: {}]  }
   0x1   :  { %v26_v0 = vld [vmem:[%s219_s1 + $0x38] sm:$0xff]  ;;  %v25_v1 = vld [vmem:[%s219_s1 + $0x30] sm:$0xff]  ;;  %v24_v2 = vld [vmem:[%s219_s1 + $0x28] sm:$0xff] }
   0x2   :  { %100 = vmatpush.msra.mxu2 %v26_v0  ;;  %101 = vmatpush.msra.mxu3 %v26_v0  ;;  %v23_v3 = vld [vmem:[%s219_s1 + $0x20] sm:$0xff] }
   0x3   :  { %52 = vmatpush.msra.mxu0 %v26_v0  ;;  %99 = vmatpush.msra.mxu1 %v26_v0 }
   0x4   :  { %103 = vmatpush.msra.mxu2 %v25_v1  ;;  %104 = vmatpush.msra.mxu3 %v25_v1 }
   0x5   :  { %53 = vmatpush.msra.mxu0 %v25_v1  ;;  %102 = vmatpush.msra.mxu1 %v25_v1 }
   0x6   :  { %8 = vsyncpa [#allocation3], 0  ;;  %106 = vmatpush.msra.mxu2 %v24_v2  ;;  %107 = vmatpush.msra.mxu3 %v24_v2  ;;  %v22_v4 = vld [vmem:[%s219_s1 + $0x18] sm:$0xff]  ;;  %v21_v5 = vld [vmem:[%s219_s1 + $0x10] sm:$0xff]  ;;  %vm31_vm0 = vcmask 523264   ;;  %s153_s10 = smov [#allocation2]  }
   0x7   :  { %54 = vmatpush.msra.mxu0 %v24_v2  ;;  %105 = vmatpush.msra.mxu1 %v24_v2  ;;  %v20_v6 = vld [vmem:[%s219_s1 + $0x8] sm:$0xff]  ;;  %v19_v7 = vld [vmem:[%s219_s1] sm:$0xff]  ;;  %v17_v8 = vld [vmem:[%s218_s0 + $0x10] sm:$0xff]  ;;  %s81_s11 = sshll.u32 %s153_s10, 4  ;;  %s155_s14 = smov 8   ;;  %s82_s11 = int_to_ptr.vmem [resolvable:$true] %s81_s11 }
   0x8   :  { %109 = vmatpush.msra.mxu2 %v23_v3  ;;  %110 = vmatpush.msra.mxu3 %v23_v3  ;;  %v18_v9 = vld [vmem:[%s218_s0 + $0x18] sm:$0xff]  ;;  %v15_v10 = vld [vmem:[%s218_s0] sm:$0xff]  ;;  %v16_v11 = vld [vmem:[%s218_s0 + $0x8] sm:$0xff]  ;;  %s83_s0 = sshll.u32 %s221_s3, 4  ;;  %s84_s0 = int_to_ptr.hbm [resolvable:$true] %s83_s0 }
   0x9   :  { %55 = vmatpush.msra.mxu0 %v23_v3  ;;  %108 = vmatpush.msra.mxu1 %v23_v3  ;;  %v126_v12 = vld [vmem:[%s220_s2] ss:$0 sm:$0xff]  ;;  %s154_s2 = smov 128  }
   0xa   :  { %112 = vmatpush.msra.mxu2 %v22_v4  ;;  %113 = vmatpush.msra.mxu3 %v22_v4 }
   0xb   :  { %56 = vmatpush.msra.mxu0 %v22_v4  ;;  %111 = vmatpush.msra.mxu1 %v22_v4 }
   0xc   :  { %115 = vmatpush.msra.mxu2 %v21_v5  ;;  %116 = vmatpush.msra.mxu3 %v21_v5 }
   0xd   :  { %57 = vmatpush.msra.mxu0 %v21_v5  ;;  %114 = vmatpush.msra.mxu1 %v21_v5 }
   0xe   :  { %118 = vmatpush.msra.mxu2 %v20_v6  ;;  %119 = vmatpush.msra.mxu3 %v20_v6 }
   0xf   :  { %58 = vmatpush.msra.mxu0 %v20_v6  ;;  %117 = vmatpush.msra.mxu1 %v20_v6 }
  0x10   :  { %121 = vmatpush.msra.mxu2 %v19_v7  ;;  %122 = vmatpush.msra.mxu3 %v19_v7 }
  0x11   :  { %97 = vmatmul.msk.f32.vlgmr.msra.gmra.mxu2 %vm31_vm0, %v17_v8  ;;  %98 = vmatmul.msk.f32.vlgmr.msra.gmra.mxu3 %vm31_vm0, %v18_v9 }
  0x12   :  { %59 = vmatpush.msra.mxu0 %v19_v7  ;;  %120 = vmatpush.msra.mxu1 %v19_v7 }
  0x13   :  { %95 = vmatmul.msk.f32.vlgmr.msra.gmra.mxu0 %vm31_vm0, %v15_v10  ;;  %96 = vmatmul.msk.f32.vlgmr.msra.gmra.mxu1 %vm31_vm0, %v16_v11 }
  0x90   :  { %v61_v13 = vpop.f32.mrf.mxu0  ;;  %v64_v14 = vpop.f32.mrf.mxu1 }
  0x91   :  { %v62_v15 = vadd.f32 %v126_v12, %v61_v13  ;;  %v65_v16 = vadd.f32 %v126_v12, %v64_v14 }
  0x93   :  { %73 = vst [vmem:[#allocation2] sm:$0xff] %v62_v15 }
  0x94   :  { %74 = vst [vmem:[#allocation2 + $0x8] sm:$0xff] %v65_v16  ;;  %v67_v17 = vpop.f32.mrf.mxu2  ;;  %v70_v18 = vpop.f32.mrf.mxu3 }
  0x95   :  { %v68_v19 = vadd.f32 %v126_v12, %v67_v17  ;;  %v71_v20 = vadd.f32 %v126_v12, %v70_v18 }
  0x97   :  { %75 = vst [vmem:[#allocation2 + $0x10] sm:$0xff] %v68_v19 }
  0x98   :  { %76 = vst [vmem:[#allocation2 + $0x18] sm:$0xff] %v71_v20 }
  0x99   :  { %89 = dma.vmem_to_hbm [thread:$0]  %s82_s11, 512, %s84_s0, [#allocation3], %s154_s2, %s154_s2, %s155_s14  }
  0x9a   :  { %151 = dma.done.wait [#allocation3], 512  }
  0x9b   :  { %152 = vsyncadd [#allocation3], 4294966784 }
  0x9c   :  { %94 = vsyncpa [#allocation3], 1 }

</bundles_post_ra>
